<compile_context>
chip_gen: v7x
topology: tpu7x:2x2x1
jax: 0.10.0
libtpu: 0.0.40
codegen_flags: <defaults>
</compile_context>

<pallas_src>
import jax
import jax.numpy as jnp
from jax.experimental import pallas as pl
from jax.experimental.pallas import tpu as pltpu


def _normalize_kernel(scale_ref, x_ref, o_ref):
    # scale_ref: VMEM (TILE_R, 2) per-row constants: [:, 0] = mean, [:, 1] = 1/std
    # x_ref / o_ref: VMEM (TILE_R, TILE_C) lane-dense tiles
    x = jnp.clip(x_ref[...].astype(jnp.float32), 0.0, 1.0)
    mean = scale_ref[:, 0:1]       # (TILE_R, 1) broadcasts over lanes
    inv_std = scale_ref[:, 1:2]    # (TILE_R, 1)
    o_ref[...] = ((x - mean) * inv_std).astype(o_ref.dtype)


def _col_tile(L, target=2048, align=128):
    """Full extent if small; otherwise the largest align-multiple <= target."""
    if L <= target:
        return L
    return max((target // align) * align, align)


def _row_tile(R, target=512, align=8):
    """Full extent if small; otherwise size the tile so the row grid has an
    EVEN number of tiles (clean 2-TensorCore split on v7x) and is a multiple
    of the 8-sublane alignment."""
    if R <= target:
        return R
    n = pl.cdiv(R, target)
    if n % 2:
        n += 1
    tr = pl.cdiv(R, n)
    tr = pl.cdiv(tr, align) * align
    return min(max(tr, align), R)


def input_normalizer(x, mean, std, *, out_dtype=None, donate_x=False):
    """Pallas equivalent of InputNormalizer.forward.

    x:    [N, C, H, W] (float32 or bf16)
    mean: [C] float32
    std:  [C] float32
    out_dtype: output dtype; defaults to PyTorch-style promotion
               (x.dtype promoted with f32 mean/std -> f32).
    donate_x: if True and dtypes match, alias the input buffer to the output.
    """
    N, C, H, W = x.shape
    R = N * C          # rows:  one row per (image, channel)
    L = H * W          # cols:  flattened spatial -> lane dimension

    if out_dtype is None:
        # Matches torch type promotion: bf16 x op f32 mean/std -> f32.
        out_dtype = jnp.promote_types(x.dtype, jnp.float32)

    # Free reshape: NCHW is contiguous, so (N*C, H*W) is the same buffer.
    x2 = x.reshape(R, L)

    # Packed per-row constants: row r belongs to channel r % C.
    mean_f32 = mean.astype(jnp.float32)
    inv_std_f32 = 1.0 / std.astype(jnp.float32)
    scale_rows = jnp.stack(
        [jnp.tile(mean_f32, N), jnp.tile(inv_std_f32, N)], axis=-1)  # (R, 2)

    TILE_R = _row_tile(R)       # sublane axis: multiple of 8, or full
    TILE_C = _col_tile(L)       # lane axis: multiple of 128, or full
    grid = (pl.cdiv(R, TILE_R), pl.cdiv(L, TILE_C))

    in_bytes = R * L * jnp.dtype(x.dtype).itemsize
    out_bytes = R * L * jnp.dtype(out_dtype).itemsize
    cost = pl.CostEstimate(
        flops=3 * R * L,                       # clip + sub + mul per element
        transcendentals=0,
        bytes_accessed=in_bytes + out_bytes + R * 2 * 4,
    )

    aliases = {}
    if donate_x and jnp.dtype(out_dtype) == jnp.dtype(x.dtype):
        aliases = {1: 0}        # x2 (input index 1) -> output 0, in-place

    out2 = pl.pallas_call(
        _normalize_kernel,
        out_shape=jax.ShapeDtypeStruct((R, L), out_dtype),
        grid=grid,
        in_specs=[
            pl.BlockSpec((TILE_R, 2), lambda i, j: (i, 0)),        # [mean, 1/std]
            pl.BlockSpec((TILE_R, TILE_C), lambda i, j: (i, j)),   # x tile
        ],
        out_specs=pl.BlockSpec((TILE_R, TILE_C), lambda i, j: (i, j)),
        compiler_params=pltpu.CompilerParams(
            dimension_semantics=("parallel", "parallel"),
            vmem_limit_bytes=48 * 1024 * 1024,   # safe on v7x (64 MiB), ample on v5e/v6e
        ),
        cost_estimate=cost,
        input_output_aliases=aliases,
    )(scale_rows, x2)

    return out2.reshape(N, C, H, W)


if __name__ == "__main__":
    # Deterministic parameters matching the module's __init__ for
    # benchmark='CIFAR10', model_arch='wrn_40_2', non-AugMix weights.
    mean = jnp.array([0.49139968, 0.48215827, 0.44653124], dtype=jnp.float32)
    std = jnp.array([0.24703233, 0.24348505, 0.26158768], dtype=jnp.float32)

    key = jax.random.PRNGKey(0)
    # Values spread a bit outside [0, 1] so the clamp path is exercised.
    x = jax.random.uniform(key, (2, 3, 16, 16), dtype=jnp.float32,
                           minval=-0.25, maxval=1.25)

    out = input_normalizer(x, mean, std)
    out = jax.block_until_ready(out)

    # Reference check in plain JAX (same semantics as the PyTorch forward).
    ref = (jnp.clip(x, 0.0, 1.0) - mean[None, :, None, None]) / \
        std[None, :, None, None]
    assert out.shape == x.shape and out.dtype == x.dtype
    assert jnp.allclose(out, ref, atol=1e-6, rtol=1e-6)

    print("KERNEL_OK")
</pallas_src>

<mosaic_0001>
module attributes {stable_mosaic.version = 11 : i64} {
  func.func @_normalize_kernel(%arg0: i32, %arg1: i32, %arg2: memref<6x2xf32, #tpu.memory_space<vmem>>, %arg3: memref<6x256xf32, #tpu.memory_space<vmem>>, %arg4: memref<6x256xf32, #tpu.memory_space<vmem>>) attributes {dimension_semantics = [#tpu.dimension_semantics<parallel>, #tpu.dimension_semantics<parallel>], iteration_bounds = array<i64: 1, 1>, scalar_prefetch = 0 : i64, scratch_operands = 0 : i64, tpu.core_type = #tpu.core_type<tc>, window_params = [{transform_indices = @transform_0, window_bounds = array<i64: 6, 2>}, {transform_indices = @transform_1, window_bounds = array<i64: 6, 256>}, {transform_indices = @transform_2, window_bounds = array<i64: 6, 256>}]} {
    %c0 = arith.constant 0 : index
    %c0_0 = arith.constant 0 : index
    %0 = vector.load %arg3[%c0, %c0_0] : memref<6x256xf32, #tpu.memory_space<vmem>>, vector<6x256xf32>
    %cst = arith.constant 0.000000e+00 : f32
    %cst_1 = arith.constant 1.000000e+00 : f32
    %1 = vector.broadcast %cst : f32 to vector<6x256xf32>
    %2 = arith.maximumf %1, %0 : vector<6x256xf32>
    %3 = vector.broadcast %cst_1 : f32 to vector<6x256xf32>
    %4 = arith.minimumf %3, %2 : vector<6x256xf32>
    %c0_2 = arith.constant 0 : index
    %c0_3 = arith.constant 0 : index
    %5 = vector.load %arg2[%c0_2, %c0_3] : memref<6x2xf32, #tpu.memory_space<vmem>>, vector<6x1xf32>
    %c0_4 = arith.constant 0 : index
    %c1 = arith.constant 1 : index
    %6 = vector.load %arg2[%c0_4, %c1] : memref<6x2xf32, #tpu.memory_space<vmem>>, vector<6x1xf32>
    %7 = vector.broadcast %5 : vector<6x1xf32> to vector<6x256xf32>
    %8 = arith.subf %4, %7 : vector<6x256xf32>
    %9 = vector.broadcast %6 : vector<6x1xf32> to vector<6x256xf32>
    %10 = arith.mulf %8, %9 : vector<6x256xf32>
    %c0_5 = arith.constant 0 : index
    %c0_6 = arith.constant 0 : index
    %11 = vector.load %arg4[%c0_5, %c0_6] : memref<6x256xf32, #tpu.memory_space<vmem>>, vector<6x256xf32>
    tpu.vector_store %arg4[%c0_5, %c0_6], %10 {strides = array<i32>} : memref<6x256xf32, #tpu.memory_space<vmem>>, vector<6x256xf32>,
    return
  }
  func.func @transform_0(%arg0: i32, %arg1: i32) -> (i32, i32) {
    %c0_i32 = arith.constant 0 : i32
    %c0_i32_0 = arith.constant 0 : i32
    return %arg0, %c0_i32 : i32, i32
  }
  func.func @transform_1(%arg0: i32, %arg1: i32) -> (i32, i32) {
    %c0_i32 = arith.constant 0 : i32
    return %arg0, %arg1 : i32, i32
  }
  func.func @transform_2(%arg0: i32, %arg1: i32) -> (i32, i32) {
    %c0_i32 = arith.constant 0 : i32
    return %arg0, %arg1 : i32, i32
  }
}

</mosaic_0001>

<bundles_post_ra>
// kernel: tpu_custom_call.1
= control target key start
LH: loop header
LB: loop body
LE: loop exit
PB: predicated region body
PF: predicated region fallthrough
CT: control target
= control target key end

     0   :  { %7 = vsyncpa [#allocation3], 0  ;;  %s161_s0 = inlined_call_operand.vmem [shape: f32[6,2], index: 0, kind: input, shape index: {}]   ;;  %s162_s1 = inlined_call_operand.hbm [shape: f32[6,256], index: 1, kind: input, shape index: {}]   ;;  %s163_s2 = inlined_call_operand.hbm [shape: f32[6,256], index: 2, kind: output, shape index: {}]  }
   0x1   :  { %8 = vsyncpa [#allocation4], 0  ;;  %s115_s9 = smov [#allocation2]   ;;  %s67_s13 = scalar_lea.hbm %s162_s1, 256 }
   0x2   :  { %s17_s10 = sshll.u32 %s115_s9, 4  ;;  %p68_p0 = scmp.ne.s32.totalorder %s162_s1, %s67_s13  ;;  %s18_s10 = int_to_ptr.vmem [resolvable:$true] %s17_s10 }
   0x3   :  { %p71_p1 = scmp.lt.u32.totalorder %s67_s13, %s162_s1 }
   0x5   :  { %p73_p2 = pnand %p71_p1, %p68_p0 }
   0x7   :  { %76 = shalt.err (!%p73_p2)
}
   0x8   :  { %s77_s18 = scalar_lea.vmem %s18_s10, 256  ;;  %p82_p4 = scmp.lt.s32.totalorder %s18_s10, %s18_s10 }
   0x9   :  { %p78_p3 = scmp.ne.s32.totalorder %s18_s10, %s77_s18  ;;  %p83_p5 = scmp.lt.s32.totalorder %s77_s18, %s77_s18 }
   0xb   :  { %p84_p6 = por %p83_p5, %p82_p4 }
   0xd   :  { %p85_p7 = pnand %p84_p6, %p78_p3 }
   0xf   :  { %88 = shalt.err (!%p85_p7)
}
  0x10   :  { %20 = dma.hbm_to_vmem [thread:$0]  %s162_s1, 256, %s18_s10, [#allocation3]  }
  0x11   :  { %111 = dma.done.wait [#allocation3], 256  }
  0x12   :  { %112 = vsyncadd [#allocation3], 4294967040  ;;  %v116_v0 = vmov 0   ;;  %v30_v1 = vld [vmem:[%s161_s0] sm:$0x3f]  ;;  %v117_v2 = vmov 1  }
  0x13   :  { %65 = vset.pattern.permute.xlu0 %v116_v0  ;;  %v24_v3 = vld [vmem:[#allocation2] sm:$0x3f]  ;;  %v25_v4 = vld [vmem:[#allocation2 + $0x8] sm:$0x3f]  ;;  %s118_s1 = smov [#allocation5]  }
  0x14   :  { %33 = vperm.xlu0 %65, %v30_v1   ;;  %v26_v5 = vmax.f32 %v24_v3, 0.0  ;;  %v27_v6 = vmax.f32 %v25_v4, 0.0  ;;  %s52_s23 = sshll.u32 %s118_s1, 4  ;;  %s53_s23 = int_to_ptr.vmem [resolvable:$true] %s52_s23 }
  0x15   :  { %s89_s0 = scalar_lea.vmem %s53_s23, 256  ;;  %p94_p9 = scmp.lt.s32.totalorder %s53_s23, %s53_s23 }
  0x16   :  { %v28_v8 = vmin.f32 %v26_v5, 1.0  ;;  %v29_v9 = vmin.f32 %v27_v6, 1.0  ;;  %p90_p8 = scmp.ne.s32.totalorder %s53_s23, %s89_s0  ;;  %p95_p10 = scmp.lt.s32.totalorder %s89_s0, %s89_s0 }
  0x18   :  { %66 = vset.pattern.permute.xlu0 %v117_v2  ;;  %p96_p11 = por %p95_p10, %p94_p9 }
  0x19   :  { %39 = vperm.xlu0 %66, %v30_v1  }
  0x1a   :  { %p97_p12 = pnand %p96_p11, %p90_p8 }
  0x93   :  { %v34_v7 = vpop.permute.xlu0 %33 }
  0x94   :  { %v36_v10 = vsub.f32 %v28_v8, %v34_v7  ;;  %v37_v11 = vsub.f32 %v29_v9, %v34_v7 }
  0x98   :  { %v40_v12 = vpop.permute.xlu0 %39 }
  0x99   :  { %v42_v13 = vmul.f32 %v40_v12, %v36_v10  ;;  %v43_v14 = vmul.f32 %v40_v12, %v37_v11 }
  0x9b   :  { %44 = vst [vmem:[#allocation5] sm:$0x3f] %v42_v13  ;;  %45 = vst [vmem:[#allocation5 + $0x8] sm:$0x3f] %v43_v14 }
  0x9c   :  { %100 = shalt.err (!%p97_p12)
}
  0x9d   :  { %s101_s26 = scalar_lea.hbm %s163_s2, 256 }
  0x9e   :  { %p102_p13 = scmp.ne.s32.totalorder %s163_s2, %s101_s26  ;;  %p105_p0 = scmp.lt.u32.totalorder %s101_s26, %s163_s2 }
  0xa0   :  { %p107_p1 = pnand %p105_p0, %p102_p13 }
  0xa2   :  { %110 = shalt.err (!%p107_p1)
}
  0xa3   :  { %55 = dma.vmem_to_hbm [thread:$0]  %s53_s23, 256, %s163_s2, [#allocation4]  }
  0xa4   :  { %113 = dma.done.wait [#allocation4], 256  }
  0xa5   :  { %114 = vsyncadd [#allocation4], 4294967040 }
  0xa6   :  { %59 = vsyncpa [#allocation3], 1 }
  0xa7   :  { %60 = vsyncpa [#allocation4], 1 }

</bundles_post_ra>
